<compile_context>
chip_gen: v5e
topology: v5e:2x2
jax: 0.10.0
libtpu: 0.0.40
codegen_flags: <defaults>
</compile_context>

<pallas_src>
import functools
import math

import jax
import jax.numpy as jnp
from jax.experimental import pallas as pl
from jax.experimental.pallas import tpu as pltpu


_VMEM_LIMIT = 48 * 1024 * 1024     # < v7x physical 64 MiB, > default scoped limit
_NEG_INF = -1e30


# ----------------------------------------------------------------------------
# Tile helper: largest multiple of `quantum` dividing `dim` and <= max_tile;
# falls back to the full dim (always a legal BlockSpec).
# ----------------------------------------------------------------------------
def _pick_tile(dim, max_tile, quantum):
    if dim <= max_tile:
        return dim
    t = (max_tile // quantum) * quantum
    while t >= quantum:
        if dim % t == 0:
            return t
        t -= quantum
    return dim


# ----------------------------------------------------------------------------
# Kernel 1: tiled linear layer  y = x @ W + b   (bf16 operands, f32 accumulate)
# ----------------------------------------------------------------------------
def _linear_kernel(x_ref, w_ref, b_ref, o_ref, acc_ref):
    k = pl.program_id(2)

    @pl.when(k == 0)
    def _():
        acc_ref[...] = jnp.zeros_like(acc_ref)

    acc_ref[...] += jnp.dot(x_ref[...], w_ref[...],
                            preferred_element_type=jnp.float32)

    @pl.when(k == pl.num_programs(2) - 1)
    def _():
        o_ref[...] = (acc_ref[...] + b_ref[...]).astype(o_ref.dtype)


def pallas_linear(x, w, b, *, out_dtype=jnp.bfloat16,
                  tm_max=512, tn_max=1024, tk_max=512):
    """x: (S, Din) bf16, w: (Din, Dout) bf16, b: (1, Dout) f32 -> (S, Dout)."""
    S, Din = x.shape
    Dout = w.shape[1]
    tm = _pick_tile(S, tm_max, 8)
    tn = _pick_tile(Dout, tn_max, 128)
    tk = _pick_tile(Din, tk_max, 128)
    grid = (S // tm, Dout // tn, Din // tk)
    return pl.pallas_call(
        _linear_kernel,
        out_shape=jax.ShapeDtypeStruct((S, Dout), out_dtype),
        grid=grid,
        in_specs=[
            pl.BlockSpec((tm, tk), lambda i, j, k: (i, k)),
            pl.BlockSpec((tk, tn), lambda i, j, k: (k, j)),
            pl.BlockSpec((1, tn), lambda i, j, k: (0, j)),
        ],
        out_specs=pl.BlockSpec((tm, tn), lambda i, j, k: (i, j)),
        scratch_shapes=[pltpu.VMEM((tm, tn), jnp.float32)],
        compiler_params=pltpu.CompilerParams(
            dimension_semantics=("parallel", "parallel", "arbitrary"),
            vmem_limit_bytes=_VMEM_LIMIT,
        ),
    )(x, w, b)


# ----------------------------------------------------------------------------
# Kernel 2: flash attention with hoisted Q-RoPE, in-kernel block-diagonal mask,
#           and masked-tile skipping via scalar-prefetched segment bounds.
# ----------------------------------------------------------------------------
def _flash_attn_kernel(qmin_ref, qmax_ref, kmin_ref, kmax_ref,
                       q_ref, k_ref, v_ref, cosq_ref, sinq_ref,
                       segq_ref, segk_ref,
                       o_ref,
                       m_sc, l_sc, acc_sc, qr_sc):
    qi = pl.program_id(1)
    ki = pl.program_id(2)

    @pl.when(ki == 0)
    def _init():
        m_sc[...] = jnp.full_like(m_sc, _NEG_INF)
        l_sc[...] = jnp.zeros_like(l_sc)
        acc_sc[...] = jnp.zeros_like(acc_sc)
        # Q RoPE hoisted out of the ki loop.  The softmax scale and the
        # rotate_half sign pattern are folded into the cos/sin tables, so
        # qr = q * cos_q + swap_halves(q) * sin_q.
        q = q_ref[...].astype(jnp.float32)
        half = q.shape[-1] // 2
        q_swapped = jnp.concatenate([q[:, half:], q[:, :half]], axis=-1)
        qr = q * cosq_ref[...] + q_swapped * sinq_ref[...]
        qr_sc[...] = qr.astype(qr_sc.dtype)

    # Skip (q-tile, k-tile) pairs whose segment ranges do not overlap: every
    # score in such a tile is masked out by the block-diagonal mask.
    overlap = jnp.logical_and(qmin_ref[qi] <= kmax_ref[ki],
                              kmin_ref[ki] <= qmax_ref[qi])

    @pl.when(overlap)
    def _update():
        # QK^T on the MXU (bf16 operands, f32 accumulation), contract head dim.
        s = jax.lax.dot_general(
            qr_sc[...], k_ref[...],
            (((1,), (1,)), ((), ())),
            preferred_element_type=jnp.float32)                   # (tq, tk)

        mask = segq_ref[...] == segk_ref[...]                     # (tq, tk)
        s = jnp.where(mask, s, _NEG_INF)

        m_prev = m_sc[...]
        m_new = jnp.maximum(m_prev, jnp.max(s, axis=-1, keepdims=True))
        alpha = jnp.exp(m_prev - m_new)
        p = jnp.exp(s - m_new)
        # Rows of a partially-overlapping tile can still be fully masked
        # (before their own diagonal tile is visited) -> keep the guard.
        p = jnp.where(mask, p, 0.0)

        l_sc[...] = alpha * l_sc[...] + jnp.sum(p, axis=-1, keepdims=True)
        acc_sc[...] = alpha * acc_sc[...] + jnp.dot(
            p.astype(v_ref.dtype), v_ref[...],
            preferred_element_type=jnp.float32)
        m_sc[...] = m_new

    @pl.when(ki == pl.num_programs(2) - 1)
    def _finalize():
        o_ref[...] = (acc_sc[...] / l_sc[...]).astype(o_ref.dtype)


def pallas_flash_attention(qkv, k_rot, cos_q, sin_q, seg_id, num_heads,
                           *, tq_max=512, tk_max=512):
    """qkv: (S, 3D) bf16; k_rot: (S, D) bf16 (RoPE already applied);
    cos_q / sin_q: (S, Dh) f32 q-side RoPE tables (scale folded in, sin
    pre-signed); seg_id: (S,) int32.  Returns (S, D) bf16 attention output
    with heads concatenated along lanes (matches reshape(S, -1))."""
    S, D3 = qkv.shape
    D = D3 // 3
    H = num_heads
    Dh = D // H
    # NOTE: Dh must be a multiple of 128 (lane dim of the head-slice blocks).
    # TODO(synk): real Qwen2.5-VL vision head_dim is 80 -> pad heads to 128.

    tq = _pick_tile(S, tq_max, 8)
    tk = _pick_tile(S, tk_max, 128)      # lane / MXU-N aligned
    nq, nk = S // tq, S // tk
    grid = (H, nq, nk)

    seg_row = seg_id.reshape(S, 1)
    seg_col = seg_id.reshape(1, S)
    # Per-tile segment ranges -> lets the kernel skip fully-masked tile pairs.
    q_min = seg_id.reshape(nq, tq).min(axis=1)
    q_max = seg_id.reshape(nq, tq).max(axis=1)
    k_min = seg_id.reshape(nk, tk).min(axis=1)
    k_max = seg_id.reshape(nk, tk).max(axis=1)

    grid_spec = pltpu.PrefetchScalarGridSpec(
        num_scalar_prefetch=4,
        grid=grid,
        in_specs=[
            # Q / V head slices straight out of the (S, 3D) qkv buffer,
            # K head slices from the pre-rotated (S, D) buffer.
            pl.BlockSpec((tq, Dh), lambda h, qi, ki, *_: (qi, h)),
            pl.BlockSpec((tk, Dh), lambda h, qi, ki, *_: (ki, h)),
            pl.BlockSpec((tk, Dh), lambda h, qi, ki, *_: (ki, 2 * H + h)),
            # q-side RoPE tables (re-DMA'd only when qi changes).
            pl.BlockSpec((tq, Dh), lambda h, qi, ki, *_: (qi, 0)),
            pl.BlockSpec((tq, Dh), lambda h, qi, ki, *_: (qi, 0)),
            # Segment ids (tiny int32 vectors; no dense (S,S) bias in HBM).
            pl.BlockSpec((tq, 1), lambda h, qi, ki, *_: (qi, 0)),
            pl.BlockSpec((1, tk), lambda h, qi, ki, *_: (0, ki)),
        ],
        out_specs=pl.BlockSpec((tq, Dh), lambda h, qi, ki, *_: (qi, h)),
        scratch_shapes=[
            pltpu.VMEM((tq, 1), jnp.float32),     # running max  m
            pltpu.VMEM((tq, 1), jnp.float32),     # running sum  l
            pltpu.VMEM((tq, Dh), jnp.float32),    # output accumulator
            pltpu.VMEM((tq, Dh), jnp.bfloat16),   # rotated + scaled Q tile
        ],
    )

    return pl.pallas_call(
        _flash_attn_kernel,
        grid_spec=grid_spec,
        out_shape=jax.ShapeDtypeStruct((S, D), jnp.bfloat16),
        compiler_params=pltpu.CompilerParams(
            dimension_semantics=("parallel", "parallel", "arbitrary"),
            vmem_limit_bytes=_VMEM_LIMIT,
        ),
    )(q_min, q_max, k_min, k_max, qkv, k_rot, qkv, cos_q, sin_q,
      seg_row, seg_col)


# ----------------------------------------------------------------------------
# Module wrapper (glue in plain JAX)
# ----------------------------------------------------------------------------
def qwen_vision_sdpa_attention(hidden_states, cu_seqlens, rotary_pos_emb,
                               w_qkv, b_qkv, w_proj, b_proj, num_heads):
    """Reproduces Qwen2_5_VLVisionSdpaAttention.forward.

    hidden_states : (S, D) float32
    cu_seqlens    : (n+1,) int32, cumulative sequence lengths (0 ... S)
    rotary_pos_emb: (S, D // num_heads // 2) float32
    w_qkv         : (D, 3D), b_qkv: (1, 3D)
    w_proj        : (D, D),  b_proj: (1, D)
    """
    S, D = hidden_states.shape
    H = num_heads
    Dh = D // H
    scale = 1.0 / math.sqrt(Dh)

    # bf16 in HBM everywhere; f32 accumulation inside the kernels.
    x_bf = hidden_states.astype(jnp.bfloat16)
    w_qkv_bf = w_qkv.astype(jnp.bfloat16)
    w_proj_bf = w_proj.astype(jnp.bfloat16)

    # --- QKV projection (tiled Pallas matmul, bf16 out) ---
    qkv = pallas_linear(x_bf, w_qkv_bf, b_qkv, out_dtype=jnp.bfloat16)   # (S, 3D)

    # --- RoPE tables ---
    c = jnp.cos(rotary_pos_emb)                                   # (S, Dh/2)
    s = jnp.sin(rotary_pos_emb)
    cos = jnp.concatenate([c, c], axis=-1)                        # (S, Dh)
    sin = jnp.concatenate([s, s], axis=-1)                        # (S, Dh)
    # q-side tables with the softmax scale and the rotate_half sign folded in.
    cos_q = (cos * scale).astype(jnp.float32)
    sin_q = (jnp.concatenate([-s, s], axis=-1) * scale).astype(jnp.float32)

    # --- Pre-rotate K exactly once, outside the attention kernel (f32 math) ---
    k = qkv[:, D:2 * D].astype(jnp.float32).reshape(S, H, Dh)
    k1, k2 = k[..., :Dh // 2], k[..., Dh // 2:]
    k_rot = (k * cos[:, None, :]
             + jnp.concatenate([-k2, k1], axis=-1) * sin[:, None, :])
    k_rot = k_rot.reshape(S, D).astype(jnp.bfloat16)

    # --- Segment ids from cu_seqlens (block-diagonal mask built in-kernel) ---
    seg_id = jnp.searchsorted(cu_seqlens[1:], jnp.arange(S),
                              side="right").astype(jnp.int32)

    # --- Flash attention (output already (S, D), heads along lanes) ---
    attn = pallas_flash_attention(qkv, k_rot, cos_q, sin_q, seg_id, H)

    # --- Output projection ---
    return pallas_linear(attn, w_proj_bf, b_proj, out_dtype=jnp.float32)  # (S, D)


# ----------------------------------------------------------------------------
# Pure-JAX reference (mirrors the PyTorch forward exactly, f32 throughout)
# ----------------------------------------------------------------------------
def reference(hidden_states, cu_seqlens, rotary_pos_emb,
              w_qkv, b_qkv, w_proj, b_proj, num_heads):
    S, D = hidden_states.shape
    H = num_heads
    Dh = D // H
    qkv = hidden_states @ w_qkv + b_qkv
    qkv = qkv.reshape(S, 3, H, Dh)
    q, k, v = qkv[:, 0], qkv[:, 1], qkv[:, 2]                     # (S, H, Dh)

    cos = jnp.concatenate([jnp.cos(rotary_pos_emb)] * 2, axis=-1)[:, None, :]
    sin = jnp.concatenate([jnp.sin(rotary_pos_emb)] * 2, axis=-1)[:, None, :]

    def rope(t):
        t1, t2 = t[..., : Dh // 2], t[..., Dh // 2:]
        return t * cos + jnp.concatenate([-t2, t1], axis=-1) * sin

    q = rope(q)
    k = rope(k)

    seg_id = jnp.searchsorted(cu_seqlens[1:], jnp.arange(S), side="right")
    allow = seg_id[:, None] == seg_id[None, :]
    bias = jnp.where(allow, 0.0, -1e30).astype(jnp.float32)

    qh, kh, vh = (jnp.transpose(t, (1, 0, 2)) for t in (q, k, v))
    s = jnp.einsum("hqd,hkd->hqk", qh, kh) / math.sqrt(Dh) + bias
    p = jax.nn.softmax(s, axis=-1)
    o = jnp.einsum("hqk,hkd->hqd", p, vh)
    o = jnp.transpose(o, (1, 0, 2)).reshape(S, D)
    return o @ w_proj + b_proj


# ----------------------------------------------------------------------------
# Main
# ----------------------------------------------------------------------------
if __name__ == "__main__":
    # Small shapes consistent with the module's forward:
    #   seq=8 tokens, dim=256, num_heads=2 -> head_dim=128.
    S = 8
    D = 256
    H = 2
    Dh = D // H

    key = jax.random.PRNGKey(0)
    k_x, k_wqkv, k_bqkv, k_wp, k_bp, k_rot = jax.random.split(key, 6)

    hidden_states = jax.random.normal(k_x, (S, D), dtype=jnp.float32)
    w_qkv = jax.random.normal(k_wqkv, (D, 3 * D), dtype=jnp.float32) * (1.0 / math.sqrt(D))
    b_qkv = jax.random.normal(k_bqkv, (1, 3 * D), dtype=jnp.float32) * 0.02
    w_proj = jax.random.normal(k_wp, (D, D), dtype=jnp.float32) * (1.0 / math.sqrt(D))
    b_proj = jax.random.normal(k_bp, (1, D), dtype=jnp.float32) * 0.02
    rotary_pos_emb = jax.random.uniform(k_rot, (S, Dh // 2), dtype=jnp.float32,
                                        minval=0.0, maxval=2.0 * math.pi)
    # Two variable-length "images": tokens [0,3) and [3,8).
    cu_seqlens = jnp.array([0, 3, 8], dtype=jnp.int32)

    out = qwen_vision_sdpa_attention(
        hidden_states, cu_seqlens, rotary_pos_emb,
        w_qkv, b_qkv, w_proj, b_proj, num_heads=H)
    out = jax.block_until_ready(out)

    ref = reference(
        hidden_states, cu_seqlens, rotary_pos_emb,
        w_qkv, b_qkv, w_proj, b_proj, num_heads=H)
    ref = jax.block_until_ready(ref)

    assert out.shape == (S, D), out.shape
    # bf16 intermediates in HBM + bf16 MXU operands (f32 accumulation)
    # -> relaxed tolerance against the all-f32 reference.
    max_err = float(jnp.max(jnp.abs(out - ref)))
    assert jnp.allclose(out, ref, atol=1e-1, rtol=1e-1), max_err

    print("KERNEL_OK")
</pallas_src>

<mosaic_0001>
module attributes {stable_mosaic.version = 11 : i64} {
  func.func @_linear_kernel(%arg0: i32, %arg1: i32, %arg2: i32, %arg3: memref<8x256xbf16, #tpu.memory_space<vmem>>, %arg4: memref<256x768xbf16, #tpu.memory_space<vmem>>, %arg5: memref<1x768xf32, #tpu.memory_space<vmem>>, %arg6: memref<8x768xbf16, #tpu.memory_space<vmem>>, %arg7: memref<8x768xf32, #tpu.memory_space<vmem>>) attributes {dimension_semantics = [#tpu.dimension_semantics<parallel>, #tpu.dimension_semantics<parallel>, #tpu.dimension_semantics<arbitrary>], iteration_bounds = array<i64: 1, 1, 1>, scalar_prefetch = 0 : i64, scratch_operands = 1 : i64, tpu.core_type = #tpu.core_type<tc>, window_params = [{transform_indices = @transform_0, window_bounds = array<i64: 8, 256>}, {transform_indices = @transform_1, window_bounds = array<i64: 256, 768>}, {transform_indices = @transform_2, window_bounds = array<i64: 1, 768>}, {transform_indices = @transform_3, window_bounds = array<i64: 8, 768>}]} {
    %c0_i32 = arith.constant 0 : i32
    %0 = arith.cmpi eq, %arg2, %c0_i32 : i32
    %1 = arith.extui %0 : i1 to i32
    %c0_i32_0 = arith.constant 0 : i32
    %2 = arith.cmpi ne, %1, %c0_i32_0 : i32
    scf.if %2 {
      %cst_10 = arith.constant 0.000000e+00 : f32
      %12 = vector.broadcast %cst_10 : f32 to vector<8x768xf32>
      %c0_11 = arith.constant 0 : index
      %c0_12 = arith.constant 0 : index
      %13 = vector.load %arg7[%c0_11, %c0_12] : memref<8x768xf32, #tpu.memory_space<vmem>>, vector<8x768xf32>
      tpu.vector_store %arg7[%c0_11, %c0_12], %12 {strides = array<i32>} : memref<8x768xf32, #tpu.memory_space<vmem>>, vector<8x768xf32>,
    } else {
    }
    %c0 = arith.constant 0 : index
    %c0_1 = arith.constant 0 : index
    %3 = vector.load %arg7[%c0, %c0_1] : memref<8x768xf32, #tpu.memory_space<vmem>>, vector<8x768xf32>
    %c0_2 = arith.constant 0 : index
    %c0_3 = arith.constant 0 : index
    %4 = vector.load %arg3[%c0_2, %c0_3] : memref<8x256xbf16, #tpu.memory_space<vmem>>, vector<8x256xbf16>
    %c0_4 = arith.constant 0 : index
    %c0_5 = arith.constant 0 : index
    %5 = vector.load %arg4[%c0_4, %c0_5] : memref<256x768xbf16, #tpu.memory_space<vmem>>, vector<256x768xbf16>
    %cst = arith.constant dense<0.000000e+00> : vector<8x768xf32>
    %6 = tpu.matmul %4, %5, %cst {dimension_numbers = #tpu.dot_dimension_numbers<[1], [0], [0], [1], [0, 0, 1, 1], [], []>} : vector<8x256xbf16>, vector<256x768xbf16>, vector<8x768xf32> -> vector<8x768xf32>
    %7 = arith.addf %3, %6 : vector<8x768xf32>
    %c0_6 = arith.constant 0 : index
    %c0_7 = arith.constant 0 : index
    %8 = vector.load %arg7[%c0_6, %c0_7] : memref<8x768xf32, #tpu.memory_space<vmem>>, vector<8x768xf32>
    tpu.vector_store %arg7[%c0_6, %c0_7], %7 {strides = array<i32>} : memref<8x768xf32, #tpu.memory_space<vmem>>, vector<8x768xf32>,
    %c0_i32_8 = arith.constant 0 : i32
    %9 = arith.cmpi eq, %arg2, %c0_i32_8 : i32
    %10 = arith.extui %9 : i1 to i32
    %c0_i32_9 = arith.constant 0 : i32
    %11 = arith.cmpi ne, %10, %c0_i32_9 : i32
    scf.if %11 {
      %c0_10 = arith.constant 0 : index
      %c0_11 = arith.constant 0 : index
      %12 = vector.load %arg7[%c0_10, %c0_11] : memref<8x768xf32, #tpu.memory_space<vmem>>, vector<8x768xf32>
      %c0_12 = arith.constant 0 : index
      %c0_13 = arith.constant 0 : index
      %13 = vector.load %arg5[%c0_12, %c0_13] : memref<1x768xf32, #tpu.memory_space<vmem>>, vector<1x768xf32>
      %14 = vector.broadcast %13 : vector<1x768xf32> to vector<8x768xf32>
      %15 = arith.addf %12, %14 : vector<8x768xf32>
      %16 = arith.truncf %15 : vector<8x768xf32> to vector<8x768xbf16>
      %c0_14 = arith.constant 0 : index
      %c0_15 = arith.constant 0 : index
      %17 = vector.load %arg6[%c0_14, %c0_15] : memref<8x768xbf16, #tpu.memory_space<vmem>>, vector<8x768xbf16>
      tpu.vector_store %arg6[%c0_14, %c0_15], %16 {strides = array<i32>} : memref<8x768xbf16, #tpu.memory_space<vmem>>, vector<8x768xbf16>,
    } else {
    }
    return
  }
  func.func @transform_0(%arg0: i32, %arg1: i32, %arg2: i32) -> (i32, i32) {
    %c0_i32 = arith.constant 0 : i32
    return %arg0, %arg2 : i32, i32
  }
  func.func @transform_1(%arg0: i32, %arg1: i32, %arg2: i32) -> (i32, i32) {
    %c0_i32 = arith.constant 0 : i32
    return %arg2, %arg1 : i32, i32
  }
  func.func @transform_2(%arg0: i32, %arg1: i32, %arg2: i32) -> (i32, i32) {
    %c0_i32 = arith.constant 0 : i32
    %c0_i32_0 = arith.constant 0 : i32
    return %c0_i32, %arg1 : i32, i32
  }
  func.func @transform_3(%arg0: i32, %arg1: i32, %arg2: i32) -> (i32, i32) {
    %c0_i32 = arith.constant 0 : i32
    return %arg0, %arg1 : i32, i32
  }
}

</mosaic_0001>

<bundles_post_ra>
// kernel: tpu_custom_call.1
= control target key start
LH: loop header
LB: loop body
LE: loop exit
PB: predicated region body
PF: predicated region fallthrough
CT: control target
= control target key end

     0   :  { %8 = vsyncpa [#allocation4], 0  ;;  %s1521_s0 = inlined_call_operand.hbm [shape: bf16[8,256], index: 0, kind: input, shape index: {}]   ;;  %s1522_s1 = inlined_call_operand.hbm [shape: bf16[256,768], index: 1, kind: input, shape index: {}]   ;;  %s1523_s2 = inlined_call_operand.hbm [shape: f32[1,768], index: 2, kind: input, shape index: {}]   ;;  %s1524_s3 = inlined_call_operand.hbm [shape: bf16[8,768], index: 3, kind: output, shape index: {}]  }
   0x1   :  { %9 = vsyncpa [#allocation7], 0  ;;  %s26_s14 = sshll.u32 %s1522_s1, 4  ;;  %s27_s14 = int_to_ptr.hbm [resolvable:$true] %s26_s14 }
   0x2   :  { %10 = vsyncpa [#allocation5], 0  ;;  %s1467_s15 = smov [#allocation6]   ;;  %s16_s19 = sshll.u32 %s1521_s0, 4  ;;  %s17_s19 = int_to_ptr.hbm [resolvable:$true] %s16_s19 }
   0x3   :  { %s28_s16 = sshll.u32 %s1467_s15, 4  ;;  %s1468_s20 = smov 384   ;;  %s29_s16 = int_to_ptr.vmem [resolvable:$true] %s28_s16 }
   0x4   :  { %s1469_s21 = smov 24   ;;  %s1470_s22 = smov [#allocation3]  }
   0x5   :  { %34 = dma.hbm_to_vmem [thread:$0]  %s27_s14, 12288, %s29_s16, [#allocation7], %s1468_s20, %s1468_s20, %s1469_s21  }
   0x6   :  { %s18_s23 = sshll.u32 %s1470_s22, 4  ;;  %s40_s26 = sshll.u32 %s1523_s2, 4  ;;  %s19_s23 = int_to_ptr.vmem [resolvable:$true] %s18_s23  ;;  %s41_s26 = int_to_ptr.hbm [resolvable:$true] %s40_s26 }
   0x7   :  { %21 = dma.hbm_to_vmem [thread:$0]  %s17_s19, 128, %s19_s23, [#allocation4]  }
   0x8   :  { %s1471_s1 = smov [#allocation8]  }
   0x9   :  { %s42_s27 = sshll.u32 %s1471_s1, 4  ;;  %s43_s27 = int_to_ptr.vmem [resolvable:$true] %s42_s27 }
   0xa   :  { %45 = dma.hbm_to_vmem [thread:$0]  %s41_s26, 96, %s43_s27, [#allocation7]  }
   0xb   :  { %1461 = dma.done.wait [#allocation4], 128  }
   0xc   :  { %1462 = vsyncadd [#allocation4], 4294967168 }
   0xd   :  { %1463 = dma.done.wait [#allocation7], 12384  }
   0xe   :  { %1464 = vsyncadd [#allocation7], 4294954912  ;;  %v1049_v0 = vld [vmem:[#allocation6 + $0x150] sm:$0xf]  ;;  %v1308_v1 = vld [vmem:[#allocation6 + $0x164] sm:$0xf0] }
   0xf   :  { %v1241_v2 = vld [vmem:[#allocation6 + $0x2d0] sm:$0xf]  ;;  %v1050_v3 = vor.u32 %v1308_v1, %v1049_v0  ;;  %v1356_v4 = vld [vmem:[#allocation6 + $0x2e4] sm:$0xf0]  ;;  %v1305_v5 = vld [vmem:[#allocation6 + $0x154] sm:$0xf] }
  0x10   :  { %v1051_v6 = vld [vmem:[#allocation6 + $0x168] sm:$0xf0]  ;;  %v1242_v7 = vor.u32 %v1356_v4, %v1241_v2  ;;  %v1353_v9 = vld [vmem:[#allocation6 + $0x2d4] sm:$0xf]  ;;  %v1025_v11 = vld [vmem:[#allocation6 + $0x120] sm:$0xf] }
  0x11   :  { %v1054_v8 = vor.u32 %v1305_v5, %v1051_v6  ;;  %v1243_v10 = vld [vmem:[#allocation6 + $0x2e8] sm:$0xf0]  ;;  %658 = vmatpush.bf16.msra.mxu0 %v1050_v3  ;;  %v1302_v13 = vld [vmem:[#allocation6 + $0x134] sm:$0xf0]  ;;  %v1217_v14 = vld [vmem:[#allocation6 + $0x2a0] sm:$0xf] }
  0x12   :  { %v1246_v12 = vor.u32 %v1353_v9, %v1243_v10  ;;  %v1350_v15 = vld [vmem:[#allocation6 + $0x2b4] sm:$0xf0]  ;;  %671 = vmatpush.bf16.msra.mxu1 %v1242_v7  ;;  %v1026_v16 = vor.u32 %v1302_v13, %v1025_v11  ;;  %v1299_v18 = vld [vmem:[#allocation6 + $0x124] sm:$0xf]  ;;  %v1027_v19 = vld [vmem:[#allocation6 + $0x138] sm:$0xf0] }
  0x13   :  { %684 = vmatpush.bf16.msra.mxu2 %v1054_v8  ;;  %v1218_v17 = vor.u32 %v1350_v15, %v1217_v14  ;;  %v1347_v20 = vld [vmem:[#allocation6 + $0x2a4] sm:$0xf]  ;;  %v1030_v21 = vor.u32 %v1299_v18, %v1027_v19  ;;  %v1219_v22 = vld [vmem:[#allocation6 + $0x2b8] sm:$0xf0]  ;;  %v1001_v23 = vld [vmem:[#allocation6 + $0xf0] sm:$0xf] }
  0x14   :  { %697 = vmatpush.bf16.msra.mxu3 %v1246_v12  ;;  %v1296_v24 = vld [vmem:[#allocation6 + $0x104] sm:$0xf0]  ;;  %v1222_v25 = vor.u32 %v1347_v20, %v1219_v22  ;;  %v1193_v26 = vld [vmem:[#allocation6 + $0x270] sm:$0xf]  ;;  %v1293_v28 = vld [vmem:[#allocation6 + $0xf4] sm:$0xf] }
  0x15   :  { %v1344_v27 = vld [vmem:[#allocation6 + $0x284] sm:$0xf0]  ;;  %659 = vmatpush.bf16.msra.mxu0 %v1026_v16  ;;  %v1002_v29 = vor.u32 %v1296_v24, %v1001_v23  ;;  %v1003_v30 = vld [vmem:[#allocation6 + $0x108] sm:$0xf0]  ;;  %v1341_v31 = vld [vmem:[#allocation6 + $0x274] sm:$0xf] }
  0x16   :  { %v1195_v32 = vld [vmem:[#allocation6 + $0x288] sm:$0xf0]  ;;  %672 = vmatpush.bf16.msra.mxu1 %v1218_v17  ;;  %v1194_v33 = vor.u32 %v1344_v27, %v1193_v26  ;;  %v1006_v34 = vor.u32 %v1293_v28, %v1003_v30  ;;  %v977_v35 = vld [vmem:[#allocation6 + $0xc0] sm:$0xf]  ;;  %v1290_v36 = vld [vmem:[#allocation6 + $0xd4] sm:$0xf0] }
  0x17   :  { %685 = vmatpush.bf16.msra.mxu2 %v1030_v21  ;;  %v1169_v37 = vld [vmem:[#allocation6 + $0x240] sm:$0xf]  ;;  %v1198_v38 = vor.u32 %v1341_v31, %v1195_v32  ;;  %v1338_v39 = vld [vmem:[#allocation6 + $0x254] sm:$0xf0]  ;;  %v1287_v40 = vld [vmem:[#allocation6 + $0xc4] sm:$0xf]  ;;  %v978_v44 = vor.u32 %v1290_v36, %v977_v35 }
  0x18   :  { %698 = vmatpush.bf16.msra.mxu3 %v1222_v25  ;;  %v979_v41 = vld [vmem:[#allocation6 + $0xd8] sm:$0xf0]  ;;  %v1335_v42 = vld [vmem:[#allocation6 + $0x244] sm:$0xf]  ;;  %v1170_v45 = vor.u32 %v1338_v39, %v1169_v37  ;;  %v953_v47 = vld [vmem:[#allocation6 + $0x90] sm:$0xf] }
  0x19   :  { %v1171_v43 = vld [vmem:[#allocation6 + $0x258] sm:$0xf0]  ;;  %660 = vmatpush.bf16.msra.mxu0 %v1002_v29  ;;  %v982_v46 = vor.u32 %v1287_v40, %v979_v41  ;;  %v1284_v48 = vld [vmem:[#allocation6 + $0xa4] sm:$0xf0]  ;;  %v1145_v49 = vld [vmem:[#allocation6 + $0x210] sm:$0xf] }
  0x1a   :  { %673 = vmatpush.bf16.msra.mxu1 %v1194_v33  ;;  %v1174_v50 = vor.u32 %v1335_v42, %v1171_v43  ;;  %v1332_v51 = vld [vmem:[#allocation6 + $0x224] sm:$0xf0]  ;;  %v1281_v52 = vld [vmem:[#allocation6 + $0x94] sm:$0xf]  ;;  %v955_v53 = vld [vmem:[#allocation6 + $0xa8] sm:$0xf0]  ;;  %v954_v56 = vor.u32 %v1284_v48, %v953_v47 }
  0x1b   :  { %686 = vmatpush.bf16.msra.mxu2 %v1006_v34  ;;  %v1329_v54 = vld [vmem:[#allocation6 + $0x214] sm:$0xf]  ;;  %v1147_v55 = vld [vmem:[#allocation6 + $0x228] sm:$0xf0]  ;;  %v1146_v57 = vor.u32 %v1332_v51, %v1145_v49  ;;  %v958_v58 = vor.u32 %v1281_v52, %v955_v53  ;;  %v929_v59 = vld [vmem:[#allocation6 + $0x60] sm:$0xf] }
  0x1c   :  { %699 = vmatpush.bf16.msra.mxu3 %v1198_v38  ;;  %v1278_v60 = vld [vmem:[#allocation6 + $0x74] sm:$0xf0]  ;;  %v1121_v61 = vld [vmem:[#allocation6 + $0x1e0] sm:$0xf]  ;;  %v1150_v62 = vor.u32 %v1329_v54, %v1147_v55  ;;  %v1275_v0 = vld [vmem:[#allocation6 + $0x64] sm:$0xf] }
  0x1d   :  { %661 = vmatpush.bf16.msra.mxu0 %v978_v44  ;;  %v1326_v63 = vld [vmem:[#allocation6 + $0x1f4] sm:$0xf0]  ;;  %v931_v1 = vld [vmem:[#allocation6 + $0x78] sm:$0xf0]  ;;  %v1323_v2 = vld [vmem:[#allocation6 + $0x1e4] sm:$0xf]  ;;  %v930_v4 = vor.u32 %v1278_v60, %v929_v59 }
  0x1e   :  { %674 = vmatpush.bf16.msra.mxu1 %v1170_v45  ;;  %v1123_v3 = vld [vmem:[#allocation6 + $0x1f8] sm:$0xf0]  ;;  %v1122_v5 = vor.u32 %v1326_v63, %v1121_v61  ;;  %v934_v6 = vor.u32 %v1275_v0, %v931_v1  ;;  %v905_v7 = vld [vmem:[#allocation6 + $0x30] sm:$0xf]  ;;  %v1272_v8 = vld [vmem:[#allocation6 + $0x44] sm:$0xf0] }
  0x1f   :  { %687 = vmatpush.bf16.msra.mxu2 %v982_v46  ;;  %v1097_v9 = vld [vmem:[#allocation6 + $0x1b0] sm:$0xf]  ;;  %v1126_v10 = vor.u32 %v1323_v2, %v1123_v3  ;;  %v1320_v11 = vld [vmem:[#allocation6 + $0x1c4] sm:$0xf0]  ;;  %v1269_v12 = vld [vmem:[#allocation6 + $0x34] sm:$0xf]  ;;  %v906_v16 = vor.u32 %v1272_v8, %v905_v7 }
  0x20   :  { %700 = vmatpush.bf16.msra.mxu3 %v1174_v50  ;;  %v907_v13 = vld [vmem:[#allocation6 + $0x48] sm:$0xf0]  ;;  %v1317_v14 = vld [vmem:[#allocation6 + $0x1b4] sm:$0xf]  ;;  %v881_v17 = vld [vmem:[#allocation6] sm:$0xf]  ;;  %v1098_v19 = vor.u32 %v1320_v11, %v1097_v9 }
  0x21   :  { %662 = vmatpush.bf16.msra.mxu0 %v954_v56  ;;  %v1099_v15 = vld [vmem:[#allocation6 + $0x1c8] sm:$0xf0]  ;;  %v1266_v18 = vld [vmem:[#allocation6 + $0x14] sm:$0xf0]  ;;  %v910_v20 = vor.u32 %v1269_v12, %v907_v13  ;;  %v1073_v21 = vld [vmem:[#allocation6 + $0x180] sm:$0xf] }
  0x22   :  { %675 = vmatpush.bf16.msra.mxu1 %v1146_v57  ;;  %v1314_v22 = vld [vmem:[#allocation6 + $0x194] sm:$0xf0]  ;;  %v1263_v23 = vld [vmem:[#allocation6 + $0x4] sm:$0xf]  ;;  %v1102_v24 = vor.u32 %v1317_v14, %v1099_v15  ;;  %v883_v25 = vld [vmem:[#allocation6 + $0x18] sm:$0xf0]  ;;  %v882_v31 = vor.u32 %v1266_v18, %v881_v17 }
  0x23   :  { %688 = vmatpush.bf16.msra.mxu2 %v958_v58  ;;  %v1311_v26 = vld [vmem:[#allocation6 + $0x184] sm:$0xf]  ;;  %v1075_v27 = vld [vmem:[#allocation6 + $0x198] sm:$0xf0]  ;;  %v1057_v28 = vld [vmem:[#allocation6 + $0x158] sm:$0xf]  ;;  %v1074_v35 = vor.u32 %v1314_v22, %v1073_v21  ;;  %v886_v36 = vor.u32 %v1263_v23, %v883_v25 }
  0x24   :  { %701 = vmatpush.bf16.msra.mxu3 %v1150_v62  ;;  %v1309_v29 = vld [vmem:[#allocation6 + $0x16c] sm:$0xf0]  ;;  %v1249_v30 = vld [vmem:[#allocation6 + $0x2d8] sm:$0xf]  ;;  %v1306_v33 = vld [vmem:[#allocation6 + $0x15c] sm:$0xf]  ;;  %v1078_v39 = vor.u32 %v1311_v26, %v1075_v27 }
  0x25   :  { %663 = vmatpush.bf16.msra.mxu0 %v930_v4  ;;  %v1357_v32 = vld [vmem:[#allocation6 + $0x2ec] sm:$0xf0]  ;;  %v1059_v34 = vld [vmem:[#allocation6 + $0x170] sm:$0xf0]  ;;  %v1354_v37 = vld [vmem:[#allocation6 + $0x2dc] sm:$0xf]  ;;  %v1058_v40 = vor.u32 %v1309_v29, %v1057_v28 }
  0x26   :  { %676 = vmatpush.bf16.msra.mxu1 %v1122_v5  ;;  %v1251_v38 = vld [vmem:[#allocation6 + $0x2f0] sm:$0xf0]  ;;  %v1250_v41 = vor.u32 %v1357_v32, %v1249_v30  ;;  %v1062_v42 = vor.u32 %v1306_v33, %v1059_v34  ;;  %v1033_v43 = vld [vmem:[#allocation6 + $0x128] sm:$0xf]  ;;  %v1303_v44 = vld [vmem:[#allocation6 + $0x13c] sm:$0xf0] }
  0x27   :  { %689 = vmatpush.bf16.msra.mxu2 %v934_v6  ;;  %v1225_v45 = vld [vmem:[#allocation6 + $0x2a8] sm:$0xf]  ;;  %v1254_v46 = vor.u32 %v1354_v37, %v1251_v38  ;;  %v1351_v47 = vld [vmem:[#allocation6 + $0x2bc] sm:$0xf0]  ;;  %v1300_v48 = vld [vmem:[#allocation6 + $0x12c] sm:$0xf]  ;;  %v1034_v52 = vor.u32 %v1303_v44, %v1033_v43 }
  0x28   :  { %702 = vmatpush.bf16.msra.mxu3 %v1126_v10  ;;  %v1035_v49 = vld [vmem:[#allocation6 + $0x140] sm:$0xf0]  ;;  %v1348_v50 = vld [vmem:[#allocation6 + $0x2ac] sm:$0xf]  ;;  %v1009_v53 = vld [vmem:[#allocation6 + $0xf8] sm:$0xf]  ;;  %v1226_v54 = vor.u32 %v1351_v47, %v1225_v45 }
  0x29   :  { %664 = vmatpush.bf16.msra.mxu0 %v906_v16  ;;  %v1227_v51 = vld [vmem:[#allocation6 + $0x2c0] sm:$0xf0]  ;;  %v1038_v55 = vor.u32 %v1300_v48, %v1035_v49  ;;  %v1297_v56 = vld [vmem:[#allocation6 + $0x10c] sm:$0xf0]  ;;  %v1201_v57 = vld [vmem:[#allocation6 + $0x278] sm:$0xf] }
  0x2a   :  { %677 = vmatpush.bf16.msra.mxu1 %v1098_v19  ;;  %v74_v58 = vld [vmem:[#allocation3] sm:$0xff]  ;;  %v1230_v59 = vor.u32 %v1348_v50, %v1227_v51  ;;  %v1345_v60 = vld [vmem:[#allocation6 + $0x28c] sm:$0xf0]  ;;  %v1011_v62 = vld [vmem:[#allocation6 + $0x110] sm:$0xf0]  ;;  %v1010_v3 = vor.u32 %v1297_v56, %v1009_v53  ;;  %s1472_s0 = smov [#allocation9]  }
  0x2b   :  { %690 = vmatpush.bf16.msra.mxu2 %v910_v20  ;;  %v1294_v61 = vld [vmem:[#allocation6 + $0xfc] sm:$0xf]  ;;  %v172_v63 = vunpack.c.l.b16 %v74_v58  ;;  %v173_v0 = vunpack.c.h.b16 %v74_v58  ;;  %v1203_v2 = vld [vmem:[#allocation6 + $0x290] sm:$0xf0]  ;;  %v1202_v6 = vor.u32 %v1345_v60, %v1201_v57  ;;  %v985_v8 = vld [vmem:[#allocation6 + $0xc8] sm:$0xf] }
  0x2c   :  { %703 = vmatpush.bf16.msra.mxu3 %v1102_v24  ;;  %v1342_v1 = vld [vmem:[#allocation6 + $0x27c] sm:$0xf]  ;;  %v1014_v7 = vor.u32 %v1294_v61, %v1011_v62  ;;  %v1291_v9 = vld [vmem:[#allocation6 + $0xdc] sm:$0xf0]  ;;  %v1177_v10 = vld [vmem:[#allocation6 + $0x248] sm:$0xf] }
  0x2d   :  { %665 = vmatpush.bf16.msra.mxu0 %v882_v31  ;;  %v1502_v4 = vpack.c.b16 %v172_v63, %v172_v63  ;;  %v1504_v5 = vpack.c.b16 %v173_v0, %v173_v0  ;;  %v1206_v11 = vor.u32 %v1342_v1, %v1203_v2  ;;  %v1339_v12 = vld [vmem:[#allocation6 + $0x25c] sm:$0xf0]  ;;  %v1288_v13 = vld [vmem:[#allocation6 + $0xcc] sm:$0xf]  ;;  %v987_v14 = vld [vmem:[#allocation6 + $0xe0] sm:$0xf0]  ;;  %v986_v17 = vor.u32 %v1291_v9, %v985_v8 }
  0x2e   :  { %678 = vmatpush.bf16.msra.mxu1 %v1074_v35  ;;  %v1336_v15 = vld [vmem:[#allocation6 + $0x24c] sm:$0xf]  ;;  %v1179_v16 = vld [vmem:[#allocation6 + $0x260] sm:$0xf0]  ;;  %v1178_v18 = vor.u32 %v1339_v12, %v1177_v10  ;;  %v990_v19 = vor.u32 %v1288_v13, %v987_v14  ;;  %v961_v20 = vld [vmem:[#allocation6 + $0x98] sm:$0xf] }
  0x2f   :  { %691 = vmatpush.bf16.msra.mxu2 %v886_v36  ;;  %v1285_v21 = vld [vmem:[#allocation6 + $0xac] sm:$0xf0]  ;;  %v1153_v22 = vld [vmem:[#allocation6 + $0x218] sm:$0xf]  ;;  %v1182_v23 = vor.u32 %v1336_v15, %v1179_v16  ;;  %v1282_v25 = vld [vmem:[#allocation6 + $0x9c] sm:$0xf] }
  0x30   :  { %704 = vmatpush.bf16.msra.mxu3 %v1078_v39  ;;  %666 = vmatmul.bf16.vlgmr.msra.gmra.mxu0 %v1502_v4  ;;  %v1333_v24 = vld [vmem:[#allocation6 + $0x22c] sm:$0xf0]  ;;  %v963_v26 = vld [vmem:[#allocation6 + $0xb0] sm:$0xf0]  ;;  %v1330_v27 = vld [vmem:[#allocation6 + $0x21c] sm:$0xf]  ;;  %v962_v29 = vor.u32 %v1285_v21, %v961_v20 }
  0x31   :  { %710 = vmatpush.bf16.msrb.mxu0 %v1058_v40  ;;  %679 = vmatmul.bf16.vlgmr.msra.gmra.mxu1 %v1504_v5  ;;  %v1155_v28 = vld [vmem:[#allocation6 + $0x230] sm:$0xf0]  ;;  %v1154_v30 = vor.u32 %v1333_v24, %v1153_v22  ;;  %v966_v31 = vor.u32 %v1282_v25, %v963_v26  ;;  %v937_v32 = vld [vmem:[#allocation6 + $0x68] sm:$0xf]  ;;  %v1279_v33 = vld [vmem:[#allocation6 + $0x7c] sm:$0xf0] }
  0x32   :  { %723 = vmatpush.bf16.msrb.mxu1 %v1250_v41  ;;  %692 = vmatmul.bf16.vlgmr.msra.gmra.mxu2 %v1502_v4  ;;  %v1129_v34 = vld [vmem:[#allocation6 + $0x1e8] sm:$0xf]  ;;  %v1158_v35 = vor.u32 %v1330_v27, %v1155_v28  ;;  %v1327_v36 = vld [vmem:[#allocation6 + $0x1fc] sm:$0xf0]  ;;  %v1276_v37 = vld [vmem:[#allocation6 + $0x6c] sm:$0xf]  ;;  %v938_v41 = vor.u32 %v1279_v33, %v937_v32 }
  0x33   :  { %736 = vmatpush.bf16.msrb.mxu2 %v1062_v42  ;;  %705 = vmatmul.bf16.vlgmr.msra.gmra.mxu3 %v1504_v5  ;;  %v939_v38 = vld [vmem:[#allocation6 + $0x80] sm:$0xf0]  ;;  %v1324_v39 = vld [vmem:[#allocation6 + $0x1ec] sm:$0xf]  ;;  %v1130_v42 = vor.u32 %v1327_v36, %v1129_v34  ;;  %v913_v44 = vld [vmem:[#allocation6 + $0x38] sm:$0xf] }
  0x34   :  { %749 = vmatpush.bf16.msrb.mxu3 %v1254_v46  ;;  %v1131_v40 = vld [vmem:[#allocation6 + $0x200] sm:$0xf0]  ;;  %v942_v43 = vor.u32 %v1276_v37, %v939_v38  ;;  %v1273_v45 = vld [vmem:[#allocation6 + $0x4c] sm:$0xf0]  ;;  %v1105_v46 = vld [vmem:[#allocation6 + $0x1b8] sm:$0xf] }
  0x35   :  { %711 = vmatpush.bf16.msrb.mxu0 %v1034_v52  ;;  %v1134_v47 = vor.u32 %v1324_v39, %v1131_v40  ;;  %v1321_v48 = vld [vmem:[#allocation6 + $0x1cc] sm:$0xf0]  ;;  %v1270_v49 = vld [vmem:[#allocation6 + $0x3c] sm:$0xf]  ;;  %v915_v50 = vld [vmem:[#allocation6 + $0x50] sm:$0xf0]  ;;  %v914_v53 = vor.u32 %v1273_v45, %v913_v44 }
  0x36   :  { %724 = vmatpush.bf16.msrb.mxu1 %v1226_v54  ;;  %v1318_v51 = vld [vmem:[#allocation6 + $0x1bc] sm:$0xf]  ;;  %v1107_v52 = vld [vmem:[#allocation6 + $0x1d0] sm:$0xf0]  ;;  %v889_v54 = vld [vmem:[#allocation6 + $0x8] sm:$0xf]  ;;  %v1106_v56 = vor.u32 %v1321_v48, %v1105_v46  ;;  %v918_v57 = vor.u32 %v1270_v49, %v915_v50 }
  0x37   :  { %737 = vmatpush.bf16.msrb.mxu2 %v1038_v55  ;;  %v1267_v55 = vld [vmem:[#allocation6 + $0x1c] sm:$0xf0]  ;;  %v1081_v58 = vld [vmem:[#allocation6 + $0x188] sm:$0xf]  ;;  %v1264_v60 = vld [vmem:[#allocation6 + $0xc] sm:$0xf]  ;;  %v1110_v61 = vor.u32 %v1318_v51, %v1107_v52 }
  0x38   :  { %750 = vmatpush.bf16.msrb.mxu3 %v1230_v59  ;;  %v1315_v59 = vld [vmem:[#allocation6 + $0x19c] sm:$0xf0]  ;;  %v891_v62 = vld [vmem:[#allocation6 + $0x20] sm:$0xf0]  ;;  %v1312_v63 = vld [vmem:[#allocation6 + $0x18c] sm:$0xf] }
  0x39   :  { %712 = vmatpush.bf16.msrb.mxu0 %v1010_v3  ;;  %v1083_v0 = vld [vmem:[#allocation6 + $0x1a0] sm:$0xf0]  ;;  %v1065_v1 = vld [vmem:[#allocation6 + $0x160] sm:$0xf]  ;;  %v1310_v2 = vld [vmem:[#allocation6 + $0x174] sm:$0xf0]  ;;  %v1082_v10 = vor.u32 %v1315_v59, %v1081_v58 }
  0x3a   :  { %725 = vmatpush.bf16.msrb.mxu1 %v1202_v6  ;;  %v1257_v3 = vld [vmem:[#allocation6 + $0x2e0] sm:$0xf]  ;;  %v890_v6 = vor.u32 %v1267_v55, %v889_v54  ;;  %v1307_v8 = vld [vmem:[#allocation6 + $0x164] sm:$0xf]  ;;  %v1067_v9 = vld [vmem:[#allocation6 + $0x178] sm:$0xf0]  ;;  %v1086_v14 = vor.u32 %v1312_v63, %v1083_v0  ;;  %v1066_v15 = vor.u32 %v1310_v2, %v1065_v1 }
  0x3b   :  { %738 = vmatpush.bf16.msrb.mxu2 %v1014_v7  ;;  %v1358_v7 = vld [vmem:[#allocation6 + $0x2f4] sm:$0xf0]  ;;  %v1355_v12 = vld [vmem:[#allocation6 + $0x2e4] sm:$0xf]  ;;  %v1259_v13 = vld [vmem:[#allocation6 + $0x2f8] sm:$0xf0] }
  0x3c   :  { %751 = vmatpush.bf16.msrb.mxu3 %v1206_v11  ;;  %v894_v11 = vor.u32 %v1264_v60, %v891_v62  ;;  %v1258_v16 = vor.u32 %v1358_v7, %v1257_v3  ;;  %v1233_v20 = vld [vmem:[#allocation6 + $0x2b0] sm:$0xf]  ;;  %v1262_v21 = vor.u32 %v1355_v12, %v1259_v13  ;;  %v1352_v22 = vld [vmem:[#allocation6 + $0x2c4] sm:$0xf0]  ;;  %v1043_v24 = vld [vmem:[#allocation6 + $0x148] sm:$0xf0] }
  0x3d   :  { %713 = vmatpush.bf16.msrb.mxu0 %v986_v17  ;;  %v1070_v17 = vor.u32 %v1307_v8, %v1067_v9  ;;  %v1349_v25 = vld [vmem:[#allocation6 + $0x2b4] sm:$0xf]  ;;  %v1235_v26 = vld [vmem:[#allocation6 + $0x2c8] sm:$0xf0]  ;;  %v1234_v28 = vor.u32 %v1352_v22, %v1233_v20  ;;  %v1209_v32 = vld [vmem:[#allocation6 + $0x280] sm:$0xf] }
  0x3e   :  { %726 = vmatpush.bf16.msrb.mxu1 %v1178_v18  ;;  %v1041_v18 = vld [vmem:[#allocation6 + $0x130] sm:$0xf]  ;;  %v1238_v33 = vor.u32 %v1349_v25, %v1235_v26  ;;  %v1346_v34 = vld [vmem:[#allocation6 + $0x294] sm:$0xf0]  ;;  %v1019_v36 = vld [vmem:[#allocation6 + $0x118] sm:$0xf0] }
  0x3f   :  { %739 = vmatpush.bf16.msrb.mxu2 %v990_v19  ;;  %v1304_v19 = vld [vmem:[#allocation6 + $0x144] sm:$0xf0]  ;;  %v1343_v37 = vld [vmem:[#allocation6 + $0x284] sm:$0xf]  ;;  %v1211_v38 = vld [vmem:[#allocation6 + $0x298] sm:$0xf0]  ;;  %v1210_v40 = vor.u32 %v1346_v34, %v1209_v32 }
  0x40   :  { %752 = vmatpush.bf16.msrb.mxu3 %v1182_v23  ;;  %v1301_v23 = vld [vmem:[#allocation6 + $0x134] sm:$0xf]  ;;  %v1042_v27 = vor.u32 %v1304_v19, %v1041_v18  ;;  %v1185_v44 = vld [vmem:[#allocation6 + $0x250] sm:$0xf]  ;;  %v1214_v45 = vor.u32 %v1343_v37, %v1211_v38  ;;  %v1340_v46 = vld [vmem:[#allocation6 + $0x264] sm:$0xf0] }
  0x41   :  { %714 = vmatpush.bf16.msrb.mxu0 %v962_v29  ;;  %v1046_v29 = vor.u32 %v1301_v23, %v1043_v24  ;;  %v995_v48 = vld [vmem:[#allocation6 + $0xe8] sm:$0xf0]  ;;  %v1337_v49 = vld [vmem:[#allocation6 + $0x254] sm:$0xf]  ;;  %v1186_v52 = vor.u32 %v1340_v46, %v1185_v44  ;;  %v969_v54 = vld [vmem:[#allocation6 + $0xa0] sm:$0xf] }
  0x42   :  { %727 = vmatpush.bf16.msrb.mxu1 %v1154_v30  ;;  %v1017_v30 = vld [vmem:[#allocation6 + $0x100] sm:$0xf]  ;;  %v1187_v50 = vld [vmem:[#allocation6 + $0x268] sm:$0xf0]  ;;  %v1286_v55 = vld [vmem:[#allocation6 + $0xb4] sm:$0xf0] }
  0x43   :  { %740 = vmatpush.bf16.msrb.mxu2 %v966_v31  ;;  %v1298_v31 = vld [vmem:[#allocation6 + $0x114] sm:$0xf0]  ;;  %v1283_v59 = vld [vmem:[#allocation6 + $0xa4] sm:$0xf]  ;;  %v971_v60 = vld [vmem:[#allocation6 + $0xb8] sm:$0xf0]  ;;  %v970_v63 = vor.u32 %v1286_v55, %v969_v54 }
  0x44   :  { %753 = vmatpush.bf16.msrb.mxu3 %v1158_v35  ;;  %v1295_v35 = vld [vmem:[#allocation6 + $0x104] sm:$0xf]  ;;  %v1018_v39 = vor.u32 %v1298_v31, %v1017_v30  ;;  %v1334_v58 = vld [vmem:[#allocation6 + $0x234] sm:$0xf0]  ;;  %v1163_v62 = vld [vmem:[#allocation6 + $0x238] sm:$0xf0]  ;;  %v974_v1 = vor.u32 %v1283_v59, %v971_v60 }
  0x45   :  { %715 = vmatpush.bf16.msrb.mxu0 %v938_v41  ;;  %v1022_v41 = vor.u32 %v1295_v35, %v1019_v36  ;;  %v945_v2 = vld [vmem:[#allocation6 + $0x70] sm:$0xf]  ;;  %v1280_v3 = vld [vmem:[#allocation6 + $0x84] sm:$0xf0]  ;;  %v1277_v9 = vld [vmem:[#allocation6 + $0x74] sm:$0xf] }
  0x46   :  { %728 = vmatpush.bf16.msrb.mxu1 %v1130_v42  ;;  %v993_v42 = vld [vmem:[#allocation6 + $0xd0] sm:$0xf]  ;;  %v1328_v8 = vld [vmem:[#allocation6 + $0x204] sm:$0xf0]  ;;  %v1139_v12 = vld [vmem:[#allocation6 + $0x208] sm:$0xf0]  ;;  %v946_v13 = vor.u32 %v1280_v3, %v945_v2 }
  0x47   :  { %741 = vmatpush.bf16.msrb.mxu2 %v942_v43  ;;  %v1292_v43 = vld [vmem:[#allocation6 + $0xe4] sm:$0xf0]  ;;  %v1113_v18 = vld [vmem:[#allocation6 + $0x1c0] sm:$0xf]  ;;  %v1322_v20 = vld [vmem:[#allocation6 + $0x1d4] sm:$0xf0] }
  0x48   :  { %754 = vmatpush.bf16.msrb.mxu3 %v1134_v47  ;;  %v1289_v47 = vld [vmem:[#allocation6 + $0xd4] sm:$0xf]  ;;  %v994_v51 = vor.u32 %v1292_v43, %v993_v42  ;;  %v923_v22 = vld [vmem:[#allocation6 + $0x58] sm:$0xf0]  ;;  %v1319_v23 = vld [vmem:[#allocation6 + $0x1c4] sm:$0xf]  ;;  %v1114_v26 = vor.u32 %v1322_v20, %v1113_v18 }
  0x49   :  { %716 = vmatpush.bf16.msrb.mxu0 %v914_v53  ;;  %v998_v53 = vor.u32 %v1289_v47, %v995_v48  ;;  %v1115_v24 = vld [vmem:[#allocation6 + $0x1d8] sm:$0xf0]  ;;  %v1089_v30 = vld [vmem:[#allocation6 + $0x190] sm:$0xf]  ;;  %v1316_v32 = vld [vmem:[#allocation6 + $0x1a4] sm:$0xf0] }
  0x4a   :  { %729 = vmatpush.bf16.msrb.mxu1 %v1106_v56  ;;  %v1161_v56 = vld [vmem:[#allocation6 + $0x220] sm:$0xf]  ;;  %v1118_v31 = vor.u32 %v1319_v23, %v1115_v24  ;;  %v899_v34 = vld [vmem:[#allocation6 + $0x28] sm:$0xf0]  ;;  %v1313_v35 = vld [vmem:[#allocation6 + $0x194] sm:$0xf]  ;;  %v1090_v38 = vor.u32 %v1316_v32, %v1089_v30 }
  0x4b   :  { %742 = vmatpush.bf16.msrb.mxu2 %v918_v57  ;;  %v1190_v57 = vor.u32 %v1337_v49, %v1187_v50  ;;  %v1162_v0 = vor.u32 %v1334_v58, %v1161_v56  ;;  %v1091_v36 = vld [vmem:[#allocation6 + $0x1a8] sm:$0xf0]  ;;  %v835_v42 = vld [vmem:[#allocation8] sm:$0x3f]  ;;  %s866_s2 = sshll.u32 %s1472_s0, 4  ;;  %s868_s30 = sshll.u32 %s1524_s3, 4  ;;  %s867_s2 = int_to_ptr.vmem [resolvable:$true] %s866_s2  ;;  %s869_s30 = int_to_ptr.hbm [resolvable:$true] %s868_s30 }
  0x4c   :  { %755 = vmatpush.bf16.msrb.mxu3 %v1110_v61  ;;  %v1331_v61 = vld [vmem:[#allocation6 + $0x224] sm:$0xf]  ;;  %v838_v47 = vperm.slane %v835_v42, 1  ;;  %v839_v58 = vperm.slane %v835_v42, 2  ;;  %v840_v60 = vperm.slane %v835_v42, 3 }
  0x4d   :  { %717 = vmatpush.bf16.msrb.mxu0 %v890_v6  ;;  %v1137_v6 = vld [vmem:[#allocation6 + $0x1f0] sm:$0xf]  ;;  %v1166_v7 = vor.u32 %v1331_v61, %v1163_v62 }
  0x4e   :  { %730 = vmatpush.bf16.msrb.mxu1 %v1082_v10  ;;  %v947_v10 = vld [vmem:[#allocation6 + $0x88] sm:$0xf0] }
  0x4f   :  { %743 = vmatpush.bf16.msrb.mxu2 %v894_v11  ;;  %v1325_v11 = vld [vmem:[#allocation6 + $0x1f4] sm:$0xf] }
  0x50   :  { %756 = vmatpush.bf16.msrb.mxu3 %v1086_v14  ;;  %718 = vmatmul.bf16.vlgmr.msrb.gmra.mxu0 %v1502_v4  ;;  %v1138_v14 = vor.u32 %v1328_v8, %v1137_v6  ;;  %v1142_v19 = vor.u32 %v1325_v11, %v1139_v12  ;;  %v841_v11 = vperm.slane %v835_v42, 4 }
  0x51   :  { %762 = vmatpush.bf16.msra.mxu0 %v1066_v15  ;;  %731 = vmatmul.bf16.vlgmr.msrb.gmra.mxu1 %v1504_v5  ;;  %v950_v15 = vor.u32 %v1277_v9, %v947_v10 }
  0x52   :  { %775 = vmatpush.bf16.msra.mxu1 %v1258_v16  ;;  %744 = vmatmul.bf16.vlgmr.msrb.gmra.mxu2 %v1502_v4  ;;  %v921_v16 = vld [vmem:[#allocation6 + $0x40] sm:$0xf] }
  0x53   :  { %788 = vmatpush.bf16.msra.mxu2 %v1070_v17  ;;  %757 = vmatmul.bf16.vlgmr.msrb.gmra.mxu3 %v1504_v5  ;;  %v1274_v17 = vld [vmem:[#allocation6 + $0x54] sm:$0xf0] }
  0x54   :  { %801 = vmatpush.bf16.msra.mxu3 %v1262_v21  ;;  %v1271_v21 = vld [vmem:[#allocation6 + $0x44] sm:$0xf]  ;;  %v922_v25 = vor.u32 %v1274_v17, %v921_v16 }
  0x55   :  { %763 = vmatpush.bf16.msra.mxu0 %v1042_v27  ;;  %v926_v27 = vor.u32 %v1271_v21, %v923_v22 }
  0x56   :  { %776 = vmatpush.bf16.msra.mxu1 %v1234_v28  ;;  %v897_v28 = vld [vmem:[#allocation6 + $0x10] sm:$0xf] }
  0x57   :  { %789 = vmatpush.bf16.msra.mxu2 %v1046_v29  ;;  %v1268_v29 = vld [vmem:[#allocation6 + $0x24] sm:$0xf0] }
  0x58   :  { %802 = vmatpush.bf16.msra.mxu3 %v1238_v33  ;;  %v1265_v33 = vld [vmem:[#allocation6 + $0x14] sm:$0xf]  ;;  %v898_v37 = vor.u32 %v1268_v29, %v897_v28 }
  0x59   :  { %764 = vmatpush.bf16.msra.mxu0 %v1018_v39  ;;  %v902_v39 = vor.u32 %v1265_v33, %v899_v34 }
  0x5a   :  { %777 = vmatpush.bf16.msra.mxu1 %v1210_v40  ;;  %v1094_v40 = vor.u32 %v1313_v35, %v1091_v36 }
  0x5b   :  { %790 = vmatpush.bf16.msra.mxu2 %v1022_v41 }
  0x5c   :  { %803 = vmatpush.bf16.msra.mxu3 %v1214_v45  ;;  %v837_v45 = vperm.slane %v835_v42, 0 }
  0x5d   :  { %765 = vmatpush.bf16.msra.mxu0 %v994_v51 }
  0x5e   :  { %778 = vmatpush.bf16.msra.mxu1 %v1186_v52 }
  0x5f   :  { %791 = vmatpush.bf16.msra.mxu2 %v998_v53 }
  0x60   :  { %804 = vmatpush.bf16.msra.mxu3 %v1190_v57 }
  0x61   :  { %766 = vmatpush.bf16.msra.mxu0 %v970_v63 }
  0x62   :  { %779 = vmatpush.bf16.msra.mxu1 %v1162_v0 }
  0x63   :  { %792 = vmatpush.bf16.msra.mxu2 %v974_v1 }
  0x64   :  { %805 = vmatpush.bf16.msra.mxu3 %v1166_v7 }
  0x65   :  { %767 = vmatpush.bf16.msra.mxu0 %v946_v13  ;;  %v842_v13 = vperm.slane %v835_v42, 5 }
  0x66   :  { %780 = vmatpush.bf16.msra.mxu1 %v1138_v14 }
  0x67   :  { %793 = vmatpush.bf16.msra.mxu2 %v950_v15 }
  0x68   :  { %806 = vmatpush.bf16.msra.mxu3 %v1142_v19 }
  0x69   :  { %768 = vmatpush.bf16.msra.mxu0 %v922_v25 }
  0x6a   :  { %781 = vmatpush.bf16.msra.mxu1 %v1114_v26 }
  0x6b   :  { %794 = vmatpush.bf16.msra.mxu2 %v926_v27 }
  0x6c   :  { %807 = vmatpush.bf16.msra.mxu3 %v1118_v31 }
  0x6d   :  { %769 = vmatpush.bf16.msra.mxu0 %v898_v37 }
  0x6e   :  { %782 = vmatpush.bf16.msra.mxu1 %v1090_v38 }
  0x6f   :  { %795 = vmatpush.bf16.msra.mxu2 %v902_v39 }
  0x70   :  { %808 = vmatpush.bf16.msra.mxu3 %v1094_v40  ;;  %770 = vmatmul.bf16.vlgmr.msra.gmra.mxu0 %v1502_v4 }
  0x71   :  { %783 = vmatmul.bf16.vlgmr.msra.gmra.mxu1 %v1504_v5 }
  0x72   :  { %796 = vmatmul.bf16.vlgmr.msra.gmra.mxu2 %v1502_v4 }
  0x73   :  { %809 = vmatmul.bf16.vlgmr.msra.gmra.mxu3 %v1504_v5 }
  0xad   :  { %v667_v41 = vpop.f32.mrf.mxu0 }
  0xae   :  { %v680_v43 = vpop.f32.mrf.mxu1 }
  0xaf   :  { %v681_v44 = vadd.f32 %v680_v43, %v667_v41 }
  0xb1   :  { %v849_v49 = vadd.f32 %v837_v45, %v681_v44 }
  0xb5   :  { %v693_v46 = vpop.f32.mrf.mxu2  ;;  %v669_v51 = vpop.f32.mrf.mxu0 }
  0xb6   :  { %v706_v48 = vpop.f32.mrf.mxu3  ;;  %v682_v53 = vpop.f32.mrf.mxu1 }
  0xb7   :  { %v707_v50 = vadd.f32 %v706_v48, %v693_v46 }
  0xb9   :  { %v850_v52 = vadd.f32 %v838_v47, %v707_v50 }
  0xbb   :  { %v855_v54 = vpack.c.bf16 %v850_v52, %v849_v49 }
  0xbd   :  { %858 = vst [vmem:[#allocation9] sm:$0xff] %v855_v54  ;;  %v695_v55 = vpop.f32.mrf.mxu2 }
  0xbe   :  { %v708_v56 = vpop.f32.mrf.mxu3 }
  0xcd   :  { %v719_v4 = vpop.f32.mrf.mxu0 }
  0xce   :  { %v732_v57 = vpop.f32.mrf.mxu1 }
  0xcf   :  { %v733_v5 = vadd.f32 %v732_v57, %v719_v4 }
  0xd1   :  { %v851_v62 = vadd.f32 %v839_v58, %v733_v5 }
  0xd5   :  { %v745_v59 = vpop.f32.mrf.mxu2  ;;  %v721_v0 = vpop.f32.mrf.mxu0 }
  0xd6   :  { %v758_v61 = vpop.f32.mrf.mxu3  ;;  %v734_v2 = vpop.f32.mrf.mxu1 }
  0xd7   :  { %v759_v63 = vadd.f32 %v758_v61, %v745_v59 }
  0xd9   :  { %v852_v1 = vadd.f32 %v840_v60, %v759_v63 }
  0xdb   :  { %v856_v3 = vpack.c.bf16 %v852_v1, %v851_v62 }
  0xdd   :  { %859 = vst [vmem:[#allocation9 + $0x8] sm:$0xff] %v856_v3  ;;  %v747_v6 = vpop.f32.mrf.mxu2 }
  0xde   :  { %v760_v7 = vpop.f32.mrf.mxu3 }
  0xed   :  { %v771_v8 = vpop.f32.mrf.mxu0 }
  0xee   :  { %v784_v9 = vpop.f32.mrf.mxu1 }
  0xef   :  { %v785_v10 = vadd.f32 %v784_v9, %v771_v8 }
  0xf1   :  { %v853_v16 = vadd.f32 %v841_v11, %v785_v10 }
  0xf5   :  { %v797_v12 = vpop.f32.mrf.mxu2  ;;  %v773_v15 = vpop.f32.mrf.mxu0 }
  0xf6   :  { %v810_v14 = vpop.f32.mrf.mxu3  ;;  %v786_v18 = vpop.f32.mrf.mxu1 }
  0xf7   :  { %v811_v17 = vadd.f32 %v810_v14, %v797_v12 }
  0xf9   :  { %v854_v19 = vadd.f32 %v842_v13, %v811_v17 }
  0xfb   :  { %v857_v20 = vpack.c.bf16 %v854_v19, %v853_v16 }
  0xfd   :  { %860 = vst [vmem:[#allocation9 + $0x10] sm:$0xff] %v857_v20  ;;  %v799_v21 = vpop.f32.mrf.mxu2 }
  0xfe   :  { %v812_v22 = vpop.f32.mrf.mxu3  ;;  %871 = dma.vmem_to_hbm [thread:$0]  %s867_s2, 384, %s869_s30, [#allocation5]  }
  0xff   :  { %1465 = dma.done.wait [#allocation5], 384  }
 0x100   :  { %1466 = vsyncadd [#allocation5], 4294966912 }
 0x101   :  { %876 = vsyncpa [#allocation4], 1 }
 0x102   :  { %877 = vsyncpa [#allocation7], 1 }
 0x103   :  { %878 = vsyncpa [#allocation5], 1 }

</bundles_post_ra>
